<compile_context>
chip_gen: v7x
topology: tpu7x:2x2x1
jax: 0.10.0
libtpu: 0.0.40
codegen_flags: <defaults>
</compile_context>

<pallas_src>
import functools

import jax
import jax.numpy as jnp
from jax.experimental import pallas as pl
from jax.experimental.pallas import tpu as pltpu


def _round_up(x, m):
    return (x + m - 1) // m * m


def _lane_group(s):
    """Smallest divisor of 128 that is >= s (features are zero-padded to it)."""
    for d in (1, 2, 4, 8, 16, 32, 64, 128):
        if d >= s:
            return d
    # TODO(synk): stage_num > 128 would need a non-interleaved tiling; SSR-Net
    # uses stage_num in {3..16}, so this path is not needed.
    raise NotImplementedError("FBProb Pallas kernel supports stage_num <= 128")


def _chip_defaults():
    """(default block rows, VMEM-limit cap) tuned per TPU generation."""
    try:
        kind = jax.devices()[0].device_kind.lower()
    except Exception:  # pragma: no cover
        kind = ""
    if "v7" in kind or "7x" in kind:
        # ~8 MiB/step vs ~3.2 TB/s HBM (~88% step efficiency); only 64 MiB VMEM/TC.
        return 8192, 48 << 20
    if "v6" in kind:
        # ~8 MiB/step vs ~1.4 TB/s HBM (~94% step efficiency); 128 MiB VMEM.
        return 8192, 96 << 20
    # v5e / unknown: ~4 MiB/step vs ~0.82 TB/s HBM (~93% step efficiency).
    return 4096, 96 << 20


def fbprob_kernel(x_ref, w1_ref, b1_ref, w2_ref, b2_ref, o_ref):
    # x_ref : (Rb, 128)   interleaved samples (128//Sp per row), streamed
    # w1_ref: (128, 256)  kron(I, W1p^T), VMEM-resident across all grid steps
    # b1_ref: (1, 256)    f32, resident
    # w2_ref: (256, 128)  kron(I, W2p^T), resident
    # b2_ref: (1, 128)    f32, resident
    # o_ref : (Rb, 128)   same interleaved layout as x (lane-dense store)
    x = x_ref[...].astype(w1_ref.dtype)                  # cast in-kernel, no HBM pass
    h = jnp.dot(x, w1_ref[...], preferred_element_type=jnp.float32)   # (Rb, 256)
    h = jnp.maximum(h + b1_ref[...], 0.0)                # bias + ReLU in f32
    h = h.astype(w2_ref.dtype)
    y = jnp.dot(h, w2_ref[...], preferred_element_type=jnp.float32)   # (Rb, 128)
    y = jnp.maximum(y + b2_ref[...], 0.0)
    o_ref[...] = y.astype(o_ref.dtype)


@functools.partial(jax.jit, static_argnames=("block_rows", "compute_dtype"))
def fbprob_forward(x, w1, b1, w2, b2, *, block_rows=None,
                   compute_dtype=jnp.bfloat16):
    """FBProb forward.

    x:  (B, S)   input
    w1: (2S, S)  first Linear weight, PyTorch (out, in) layout
    b1: (2S,)    first Linear bias
    w2: (S, 2S)  second Linear weight
    b2: (S,)     second Linear bias
    block_rows:  rows of 128 lanes per grid step (per-chip auto-tune if None)
    compute_dtype: matmul operand dtype (accumulation is always f32)
    """
    B, S = x.shape
    H = 2 * S
    assert w1.shape == (H, S) and b1.shape == (H,)
    assert w2.shape == (S, H) and b2.shape == (S,)

    out_dtype = x.dtype
    cd = jnp.dtype(compute_dtype)

    # ---- Lane-interleaved problem geometry (no transposes anywhere). --------
    sp = _lane_group(S)          # features zero-padded up to a divisor of 128
    hp = 2 * sp
    g = 128 // sp                # samples per 128-lane row
    gh = g * hp                  # interleaved hidden width == 256 always

    default_rb, vmem_cap = _chip_defaults()
    rows = pl.cdiv(B, g)
    # Sub-32-bit activations pack along sublanes -> keep the row tile aligned.
    row_align = max(8, 32 // jnp.dtype(x.dtype).itemsize)
    rb = default_rb if block_rows is None else block_rows
    rb = max(row_align, _round_up(min(rb, _round_up(rows, row_align)), row_align))
    grid = pl.cdiv(rows, rb)
    r_pad = grid * rb
    b_pad = r_pad * g

    # ---- Block-diagonal weights kron(I_g, W^T).  Tiny (<=256 KiB), resident. -
    w1p = jnp.pad(w1.astype(jnp.float32), ((0, hp - H), (0, sp - S)))
    w2p = jnp.pad(w2.astype(jnp.float32), ((0, sp - S), (0, hp - H)))
    b1p = jnp.pad(b1.astype(jnp.float32), (0, hp - H))
    b2p = jnp.pad(b2.astype(jnp.float32), (0, sp - S))
    eye_g = jnp.eye(g, dtype=jnp.float32)
    w1bd = jnp.kron(eye_g, w1p.T).astype(cd)          # (128, 256)
    w2bd = jnp.kron(eye_g, w2p.T).astype(cd)          # (256, 128)
    b1bd = jnp.tile(b1p, g).reshape(1, gh)            # (1, 256) f32
    b2bd = jnp.tile(b2p, g).reshape(1, 128)           # (1, 128) f32

    # ---- Free relayout: pad only if needed, then a contiguous reshape. -------
    xp = x
    if b_pad != B or sp != S:
        xp = jnp.pad(x, ((0, b_pad - B), (0, sp - S)))
    x2 = xp.reshape(r_pad, 128)                       # bitcast-style reshape

    # VMEM budget: double-buffered in/out blocks + f32 hidden intermediates.
    in_bytes = rb * 128 * jnp.dtype(x.dtype).itemsize
    out_bytes = rb * 128 * jnp.dtype(out_dtype).itemsize
    h_bytes = rb * gh * 4
    vmem_limit = min(2 * (in_bytes + out_bytes) + 4 * h_bytes + (16 << 20),
                     vmem_cap)

    y2 = pl.pallas_call(
        fbprob_kernel,
        out_shape=jax.ShapeDtypeStruct((r_pad, 128), out_dtype),
        grid=(grid,),
        in_specs=[
            pl.BlockSpec((rb, 128), lambda i: (i, 0)),   # x: streamed over batch
            pl.BlockSpec((128, gh), lambda i: (0, 0)),   # W1bd: resident
            pl.BlockSpec((1, gh), lambda i: (0, 0)),     # b1bd: resident
            pl.BlockSpec((gh, 128), lambda i: (0, 0)),   # W2bd: resident
            pl.BlockSpec((1, 128), lambda i: (0, 0)),    # b2bd: resident
        ],
        out_specs=pl.BlockSpec((rb, 128), lambda i: (i, 0)),
        compiler_params=pltpu.CompilerParams(
            dimension_semantics=("parallel",),   # shards across v7x TensorCores
            vmem_limit_bytes=int(vmem_limit),
        ),
    )(x2, w1bd, b1bd, w2bd, b2bd)

    y = y2.reshape(b_pad, sp)                         # free contiguous reshape
    if b_pad != B or sp != S:
        y = y[:B, :S]
    return y


def init_params(key, stage_num, dtype=jnp.float32):
    """Deterministic init mimicking nn.Linear uniform(-1/sqrt(fan_in), ...)."""
    k1, k2, k3, k4 = jax.random.split(key, 4)
    s, h = stage_num, 2 * stage_num
    lim1 = 1.0 / float(s) ** 0.5
    lim2 = 1.0 / float(h) ** 0.5
    w1 = jax.random.uniform(k1, (h, s), dtype, -lim1, lim1)
    b1 = jax.random.uniform(k2, (h,), dtype, -lim1, lim1)
    w2 = jax.random.uniform(k3, (s, h), dtype, -lim2, lim2)
    b2 = jax.random.uniform(k4, (s,), dtype, -lim2, lim2)
    return w1, b1, w2, b2


def _reference(x, w1, b1, w2, b2):
    h = jnp.maximum(x @ w1.T + b1, 0.0)
    return jnp.maximum(h @ w2.T + b2, 0.0)


if __name__ == "__main__":
    stage_num = 8
    key = jax.random.PRNGKey(0)
    kx1, kx2, kx3, kp = jax.random.split(key, 4)
    w1, b1, w2, b2 = init_params(kp, stage_num)

    # Case 1: small batch (pads 32 -> 128 samples), f32 compute -> tight check.
    x1 = jax.random.normal(kx1, (32, stage_num), jnp.float32)
    out1 = fbprob_forward(x1, w1, b1, w2, b2, compute_dtype=jnp.float32)
    jax.block_until_ready(out1)
    ref1 = _reference(x1, w1, b1, w2, b2)
    assert out1.shape == x1.shape
    assert jnp.allclose(out1, ref1, atol=2e-5, rtol=2e-5)

    # Case 2: pad-free fast path (256 samples == 16 rows), default bf16 compute.
    x2 = jax.random.normal(kx2, (256, stage_num), jnp.float32)
    out2 = fbprob_forward(x2, w1, b1, w2, b2)
    jax.block_until_ready(out2)
    ref2 = _reference(x2, w1, b1, w2, b2)
    assert out2.shape == x2.shape
    assert jnp.allclose(out2, ref2, atol=5e-2, rtol=5e-2)

    # Case 3: multi-step grid (block_rows=8 -> 3 steps) + ragged batch padding.
    x3 = jax.random.normal(kx3, (300, stage_num), jnp.float32)
    out3 = fbprob_forward(x3, w1, b1, w2, b2, block_rows=8)
    jax.block_until_ready(out3)
    ref3 = _reference(x3, w1, b1, w2, b2)
    assert out3.shape == x3.shape
    assert jnp.allclose(out3, ref3, atol=5e-2, rtol=5e-2)

    print("KERNEL_OK")
</pallas_src>

<mosaic_0001>
module attributes {stable_mosaic.version = 11 : i64} {
  func.func @fbprob_kernel(%arg0: i32, %arg1: memref<8x128xf32, #tpu.memory_space<vmem>>, %arg2: memref<128x256xf32, #tpu.memory_space<vmem>>, %arg3: memref<1x256xf32, #tpu.memory_space<vmem>>, %arg4: memref<256x128xf32, #tpu.memory_space<vmem>>, %arg5: memref<1x128xf32, #tpu.memory_space<vmem>>, %arg6: memref<8x128xf32, #tpu.memory_space<vmem>>) attributes {dimension_semantics = [#tpu.dimension_semantics<parallel>], iteration_bounds = array<i64: 1>, scalar_prefetch = 0 : i64, scratch_operands = 0 : i64, tpu.core_type = #tpu.core_type<tc>, window_params = [{transform_indices = @transform_0, window_bounds = array<i64: 8, 128>}, {pipeline_mode = #tpu.pipeline_mode<synchronous>, transform_indices = @transform_1, window_bounds = array<i64: 128, 256>}, {pipeline_mode = #tpu.pipeline_mode<synchronous>, transform_indices = @transform_2, window_bounds = array<i64: 1, 256>}, {pipeline_mode = #tpu.pipeline_mode<synchronous>, transform_indices = @transform_3, window_bounds = array<i64: 256, 128>}, {pipeline_mode = #tpu.pipeline_mode<synchronous>, transform_indices = @transform_4, window_bounds = array<i64: 1, 128>}, {transform_indices = @transform_5, window_bounds = array<i64: 8, 128>}]} {
    %c0 = arith.constant 0 : index
    %c0_0 = arith.constant 0 : index
    %0 = vector.load %arg1[%c0, %c0_0] : memref<8x128xf32, #tpu.memory_space<vmem>>, vector<8x128xf32>
    %c0_1 = arith.constant 0 : index
    %c0_2 = arith.constant 0 : index
    %1 = vector.load %arg2[%c0_1, %c0_2] : memref<128x256xf32, #tpu.memory_space<vmem>>, vector<128x256xf32>
    %cst = arith.constant dense<0.000000e+00> : vector<8x256xf32>
    %2 = tpu.matmul %0, %1, %cst {dimension_numbers = #tpu.dot_dimension_numbers<[1], [0], [0], [1], [0, 0, 1, 1], [], []>} : vector<8x128xf32>, vector<128x256xf32>, vector<8x256xf32> -> vector<8x256xf32>
    %c0_3 = arith.constant 0 : index
    %c0_4 = arith.constant 0 : index
    %3 = vector.load %arg3[%c0_3, %c0_4] : memref<1x256xf32, #tpu.memory_space<vmem>>, vector<1x256xf32>
    %4 = vector.broadcast %3 : vector<1x256xf32> to vector<8x256xf32>
    %5 = arith.addf %2, %4 : vector<8x256xf32>
    %cst_5 = arith.constant 0.000000e+00 : f32
    %6 = vector.broadcast %cst_5 : f32 to vector<8x256xf32>
    %7 = arith.maximumf %5, %6 : vector<8x256xf32>
    %c0_6 = arith.constant 0 : index
    %c0_7 = arith.constant 0 : index
    %8 = vector.load %arg4[%c0_6, %c0_7] : memref<256x128xf32, #tpu.memory_space<vmem>>, vector<256x128xf32>
    %cst_8 = arith.constant dense<0.000000e+00> : vector<8x128xf32>
    %9 = tpu.matmul %7, %8, %cst_8 {dimension_numbers = #tpu.dot_dimension_numbers<[1], [0], [0], [1], [0, 0, 1, 1], [], []>} : vector<8x256xf32>, vector<256x128xf32>, vector<8x128xf32> -> vector<8x128xf32>
    %c0_9 = arith.constant 0 : index
    %c0_10 = arith.constant 0 : index
    %10 = vector.load %arg5[%c0_9, %c0_10] : memref<1x128xf32, #tpu.memory_space<vmem>>, vector<1x128xf32>
    %11 = vector.broadcast %10 : vector<1x128xf32> to vector<8x128xf32>
    %12 = arith.addf %9, %11 : vector<8x128xf32>
    %cst_11 = arith.constant 0.000000e+00 : f32
    %13 = vector.broadcast %cst_11 : f32 to vector<8x128xf32>
    %14 = arith.maximumf %12, %13 : vector<8x128xf32>
    %c0_12 = arith.constant 0 : index
    %c0_13 = arith.constant 0 : index
    %15 = vector.load %arg6[%c0_12, %c0_13] : memref<8x128xf32, #tpu.memory_space<vmem>>, vector<8x128xf32>
    tpu.vector_store %arg6[%c0_12, %c0_13], %14 {strides = array<i32>} : memref<8x128xf32, #tpu.memory_space<vmem>>, vector<8x128xf32>,
    return
  }
  func.func @transform_0(%arg0: i32) -> (i32, i32) {
    %c0_i32 = arith.constant 0 : i32
    %c0_i32_0 = arith.constant 0 : i32
    return %arg0, %c0_i32 : i32, i32
  }
  func.func @transform_1(%arg0: i32) -> (i32, i32) {
    %c0_i32 = arith.constant 0 : i32
    %c0_i32_0 = arith.constant 0 : i32
    %c0_i32_1 = arith.constant 0 : i32
    return %c0_i32, %c0_i32_0 : i32, i32
  }
  func.func @transform_2(%arg0: i32) -> (i32, i32) {
    %c0_i32 = arith.constant 0 : i32
    %c0_i32_0 = arith.constant 0 : i32
    %c0_i32_1 = arith.constant 0 : i32
    return %c0_i32, %c0_i32_0 : i32, i32
  }
  func.func @transform_3(%arg0: i32) -> (i32, i32) {
    %c0_i32 = arith.constant 0 : i32
    %c0_i32_0 = arith.constant 0 : i32
    %c0_i32_1 = arith.constant 0 : i32
    return %c0_i32, %c0_i32_0 : i32, i32
  }
  func.func @transform_4(%arg0: i32) -> (i32, i32) {
    %c0_i32 = arith.constant 0 : i32
    %c0_i32_0 = arith.constant 0 : i32
    %c0_i32_1 = arith.constant 0 : i32
    return %c0_i32, %c0_i32_0 : i32, i32
  }
  func.func @transform_5(%arg0: i32) -> (i32, i32) {
    %c0_i32 = arith.constant 0 : i32
    %c0_i32_0 = arith.constant 0 : i32
    return %arg0, %c0_i32 : i32, i32
  }
}

</mosaic_0001>

<bundles_post_ra>
// kernel: tile.13
= control target key start
LH: loop header
LB: loop body
LE: loop exit
PB: predicated region body
PF: predicated region fallthrough
CT: control target
= control target key end

     0   :  { %s28_s0 = inlined_call_operand.vmem [shape: f32[16], index: 0, kind: input, shape index: {}]   ;;  %s29_s1 = inlined_call_operand.vmem [shape: f32[16,16], index: 1, kind: output, shape index: {}]  }
   0x1   :  { %v4_v0 = vld [vmem:[%s28_s0] ss:$0 sm:$0xff] }
   0x2   :  { %5 = vst [vmem:[%s29_s1] sm:$0xff] %v4_v0  ;;  %8 = vst [vmem:[%s29_s1 + $0x8] sm:$0xff] %v4_v0 }

// kernel: tile.14
= control target key start
LH: loop header
LB: loop body
LE: loop exit
PB: predicated region body
PF: predicated region fallthrough
CT: control target
= control target key end

     0   :  { %s7_s6 = smov 3  ;;  %s21_s9 = smov 3  ;;  %vm4_vm0 = vcmask 130048   ;;  %vm11_vm1 = vcmask 1048448   ;;  %vm18_vm2 = vcmask 917248   ;;  %vm25_vm3 = vcmask 786048   ;;  %s128_s0 = inlined_call_operand.vmem [shape: f32[16,16], index: 0, kind: input, shape index: {}]   ;;  %s129_s1 = inlined_call_operand.vmem [shape: f32[1,256], index: 1, kind: output, shape index: {}]  }
   0x1   :  { %v66_v0 = vld [vmem:[%s128_s0 + $0x7] ss:$8 sm:%s7_s6]   ;;  %s81_s10 = smov 112   ;;  %v68_v1 = vld [vmem:[%s128_s0 + $0x5] ss:$8 sm:%s21_s9]   ;;  %s14_s13 = smov 3 }
   0x2   :  { %9 = vrot.lane.b32.xlu0 %v66_v0, %s81_s10  ;;  %s82_s14 = smov 80   ;;  %v67_v2 = vld [vmem:[%s128_s0 + $0x6] ss:$8 sm:%s14_s13]   ;;  %s28_s17 = smov 3  ;;  %vm32_vm4 = vcmask 654848   ;;  %vm39_vm5 = vcmask 523648  }
   0x3   :  { %23 = vrot.lane.b32.xlu1 %v68_v1, %s82_s14  ;;  %v69_v3 = vld [vmem:[%s128_s0 + $0x4] ss:$8 sm:%s28_s17]   ;;  %s35_s20 = smov 3  ;;  %s42_s21 = smov 3  ;;  %vm46_vm6 = vcmask 392448   ;;  %vm53_vm7 = vcmask 261248  }
   0x4   :  { %s83_s22 = smov 96   ;;  %s84_s23 = smov 64   ;;  %v70_v4 = vld [vmem:[%s128_s0 + $0x3] ss:$8 sm:%s35_s20]   ;;  %v71_v5 = vld [vmem:[%s128_s0 + $0x2] ss:$8 sm:%s42_s21]  }
   0x5   :  { %s2_s26 = smov 3  ;;  %s49_s29 = smov 3 }
   0x6   :  { %16 = vrot.lane.b32.xlu0 %v67_v2, %s83_s22  ;;  %v3_v6 = vld [vmem:[%s128_s0] ss:$8 sm:%s2_s26]   ;;  %s85_s3 = smov 48   ;;  %s86_s4 = smov 32  }
   0x7   :  { %30 = vrot.lane.b32.xlu1 %v69_v3, %s84_s23  ;;  %5 = vst.msk [vmem:[#allocation0] ss:$8 sm:$0x3] %vm4_vm0, %v3_v6   ;;  %v72_v7 = vld [vmem:[%s128_s0 + $0x1] ss:$8 sm:%s49_s29]   ;;  %s87_s0 = smov 16  }
   0xa   :  { %37 = vrot.lane.b32.xlu0 %v70_v4, %s85_s3 }
   0xb   :  { %44 = vrot.lane.b32.xlu1 %v71_v5, %s86_s4 }
   0xe   :  { %51 = vrot.lane.b32.xlu0 %v72_v7, %s87_s0 }
  0x74   :  { %v10_v8 = vpop.permute.xlu0 %9  }
  0x75   :  { %12 = vst.msk [vmem:[#allocation0] ss:$8 sm:$0x3] %vm11_vm1, %v10_v8   ;;  %v24_v9 = vpop.permute.xlu1 %23  }
  0x78   :  { %v17_v10 = vpop.permute.xlu0 %16  }
  0x79   :  { %19 = vst.msk [vmem:[#allocation0] ss:$8 sm:$0x3] %vm18_vm2, %v17_v10   ;;  %v31_v11 = vpop.permute.xlu1 %30  }
  0x7a   :  { %26 = vst.msk [vmem:[#allocation0] ss:$8 sm:$0x3] %vm25_vm3, %v24_v9  }
  0x7b   :  { %33 = vst.msk [vmem:[#allocation0] ss:$8 sm:$0x3] %vm32_vm4, %v31_v11  }
  0x7c   :  { %v38_v12 = vpop.permute.xlu0 %37  }
  0x7d   :  { %40 = vst.msk [vmem:[#allocation0] ss:$8 sm:$0x3] %vm39_vm5, %v38_v12   ;;  %v45_v13 = vpop.permute.xlu1 %44  }
  0x7e   :  { %47 = vst.msk [vmem:[#allocation0] ss:$8 sm:$0x3] %vm46_vm6, %v45_v13  }
  0x80   :  { %v52_v14 = vpop.permute.xlu0 %51  }
  0x81   :  { %54 = vst.msk [vmem:[#allocation0] ss:$8 sm:$0x3] %vm53_vm7, %v52_v14  }
  0x88   :  { %v58_v15 = vld [vmem:[#allocation0] sm:$0x1]  ;;  %v62_v16 = vld [vmem:[#allocation0 + $0x8] sm:$0x1] }
  0x89   :  { %60 = vst [vmem:[%s129_s1] sm:$0x1] %v58_v15  ;;  %73 = vst [vmem:[%s129_s1 + $0x1] sm:$0x1] %v62_v16 }

// kernel: tile.18
= control target key start
LH: loop header
LB: loop body
LE: loop exit
PB: predicated region body
PF: predicated region fallthrough
CT: control target
= control target key end

     0   :  { %s28_s0 = inlined_call_operand.vmem [shape: f32[8], index: 0, kind: input, shape index: {}]   ;;  %s29_s1 = inlined_call_operand.vmem [shape: f32[16,8], index: 1, kind: output, shape index: {}]  }
   0x1   :  { %v4_v0 = vld [vmem:[%s28_s0] ss:$0 sm:$0xff] }
   0x2   :  { %5 = vst [vmem:[%s29_s1] sm:$0xff] %v4_v0  ;;  %8 = vst [vmem:[%s29_s1 + $0x8] sm:$0xff] %v4_v0 }

// kernel: tile.19
= control target key start
LH: loop header
LB: loop body
LE: loop exit
PB: predicated region body
PF: predicated region fallthrough
CT: control target
= control target key end

     0   :  { %s131_s10 = smov 120   ;;  %s132_s11 = smov 104   ;;  %vm3_vm0 = vcmask 64512   ;;  %vm9_vm1 = vcmask 1048512   ;;  %vm15_vm2 = vcmask 982912   ;;  %vm21_vm3 = vcmask 917312   ;;  %s207_s0 = inlined_call_operand.vmem [shape: f32[16,8], index: 0, kind: input, shape index: {}]   ;;  %s208_s1 = inlined_call_operand.vmem [shape: f32[1,128], index: 1, kind: output, shape index: {}]  }
   0x1   :  { %v101_v0 = vld [vmem:[%s207_s0 + $0xf] sm:$0x1]   ;;  %v103_v1 = vld [vmem:[%s207_s0 + $0xd] sm:$0x1]   ;;  %v102_v2 = vld [vmem:[%s207_s0 + $0xe] sm:$0x1]  }
   0x2   :  { %7 = vrot.lane.b32.xlu0 %v101_v0, %s131_s10  ;;  %19 = vrot.lane.b32.xlu1 %v103_v1, %s132_s11  ;;  %v104_v3 = vld [vmem:[%s207_s0 + $0xc] sm:$0x1]   ;;  %s133_s16 = smov 112   ;;  %s134_s17 = smov 96   ;;  %v105_v4 = vld [vmem:[%s207_s0 + $0xb] sm:$0x1]  }
   0x3   :  { %v106_v5 = vld [vmem:[%s207_s0 + $0xa] sm:$0x1]   ;;  %v2_v6 = vld [vmem:[%s207_s0] sm:$0x1]   ;;  %s135_s24 = smov 88   ;;  %s136_s25 = smov 80  }
   0x4   :  { %4 = vst.msk [vmem:[#allocation0] sm:$0x1] %vm3_vm0, %v2_v6   ;;  %v107_v7 = vld [vmem:[%s207_s0 + $0x9] sm:$0x1]   ;;  %v108_v8 = vld [vmem:[%s207_s0 + $0x8] sm:$0x1]  }
   0x5   :  { %s137_s30 = smov 72   ;;  %s138_s2 = smov 64   ;;  %v109_v9 = vld [vmem:[%s207_s0 + $0x7] sm:$0x1]   ;;  %v110_v10 = vld [vmem:[%s207_s0 + $0x6] sm:$0x1]  }
   0x6   :  { %13 = vrot.lane.b32.xlu0 %v102_v2, %s133_s16  ;;  %25 = vrot.lane.b32.xlu1 %v104_v3, %s134_s17  ;;  %s139_s7 = smov 56   ;;  %s140_s8 = smov 48   ;;  %v111_v11 = vld [vmem:[%s207_s0 + $0x5] sm:$0x1]   ;;  %v112_v12 = vld [vmem:[%s207_s0 + $0x4] sm:$0x1]  }
   0x7   :  { %s141_s13 = smov 40   ;;  %s142_s14 = smov 32   ;;  %v113_v13 = vld [vmem:[%s207_s0 + $0x3] sm:$0x1]   ;;  %v114_v14 = vld [vmem:[%s207_s0 + $0x2] sm:$0x1]  }
   0x8   :  { %s143_s19 = smov 24   ;;  %s144_s20 = smov 16   ;;  %v115_v15 = vld [vmem:[%s207_s0 + $0x1] sm:$0x1]   ;;  %vm27_vm4 = vcmask 851712   ;;  %vm33_vm5 = vcmask 786112  }
   0x9   :  { %s145_s0 = smov 8   ;;  %vm39_vm6 = vcmask 720512   ;;  %vm45_vm7 = vcmask 654912   ;;  %vm51_vm8 = vcmask 589312   ;;  %vm57_vm9 = vcmask 523712  }
   0xa   :  { %31 = vrot.lane.b32.xlu0 %v105_v4, %s135_s24  ;;  %37 = vrot.lane.b32.xlu1 %v106_v5, %s136_s25  ;;  %vm63_vm10 = vcmask 458112   ;;  %vm69_vm11 = vcmask 392512   ;;  %vm75_vm12 = vcmask 326912   ;;  %vm81_vm13 = vcmask 261312  }
   0xb   :  { %vm87_vm14 = vcmask 195712   ;;  %vm93_vm15 = vcmask 130112  }
   0xe   :  { %43 = vrot.lane.b32.xlu0 %v107_v7, %s137_s30  ;;  %49 = vrot.lane.b32.xlu1 %v108_v8, %s138_s2 }
  0x12   :  { %55 = vrot.lane.b32.xlu0 %v109_v9, %s139_s7  ;;  %61 = vrot.lane.b32.xlu1 %v110_v10, %s140_s8 }
  0x16   :  { %67 = vrot.lane.b32.xlu0 %v111_v11, %s141_s13  ;;  %73 = vrot.lane.b32.xlu1 %v112_v12, %s142_s14 }
  0x1a   :  { %79 = vrot.lane.b32.xlu0 %v113_v13, %s143_s19  ;;  %85 = vrot.lane.b32.xlu1 %v114_v14, %s144_s20 }
  0x1e   :  { %91 = vrot.lane.b32.xlu0 %v115_v15, %s145_s0 }
  0x74   :  { %v8_v16 = vpop.permute.xlu0 %7   ;;  %v20_v17 = vpop.permute.xlu1 %19  }
  0x75   :  { %10 = vst.msk [vmem:[#allocation0] sm:$0x1] %vm9_vm1, %v8_v16  }
  0x78   :  { %v14_v18 = vpop.permute.xlu0 %13   ;;  %v26_v19 = vpop.permute.xlu1 %25  }
  0x79   :  { %16 = vst.msk [vmem:[#allocation0] sm:$0x1] %vm15_vm2, %v14_v18  }
  0x7a   :  { %22 = vst.msk [vmem:[#allocation0] sm:$0x1] %vm21_vm3, %v20_v17  }
  0x7b   :  { %28 = vst.msk [vmem:[#allocation0] sm:$0x1] %vm27_vm4, %v26_v19  }
  0x7c   :  { %v32_v20 = vpop.permute.xlu0 %31   ;;  %v38_v21 = vpop.permute.xlu1 %37  }
  0x7d   :  { %34 = vst.msk [vmem:[#allocation0] sm:$0x1] %vm33_vm5, %v32_v20  }
  0x7e   :  { %40 = vst.msk [vmem:[#allocation0] sm:$0x1] %vm39_vm6, %v38_v21  }
  0x80   :  { %v44_v22 = vpop.permute.xlu0 %43   ;;  %v50_v23 = vpop.permute.xlu1 %49  }
  0x81   :  { %46 = vst.msk [vmem:[#allocation0] sm:$0x1] %vm45_vm7, %v44_v22  }
  0x82   :  { %52 = vst.msk [vmem:[#allocation0] sm:$0x1] %vm51_vm8, %v50_v23  }
  0x84   :  { %v56_v24 = vpop.permute.xlu0 %55   ;;  %v62_v25 = vpop.permute.xlu1 %61  }
  0x85   :  { %58 = vst.msk [vmem:[#allocation0] sm:$0x1] %vm57_vm9, %v56_v24  }
  0x86   :  { %64 = vst.msk [vmem:[#allocation0] sm:$0x1] %vm63_vm10, %v62_v25  }
  0x88   :  { %v68_v26 = vpop.permute.xlu0 %67   ;;  %v74_v27 = vpop.permute.xlu1 %73  }
  0x89   :  { %70 = vst.msk [vmem:[#allocation0] sm:$0x1] %vm69_vm11, %v68_v26  }
  0x8a   :  { %76 = vst.msk [vmem:[#allocation0] sm:$0x1] %vm75_vm12, %v74_v27  }
  0x8c   :  { %v80_v28 = vpop.permute.xlu0 %79   ;;  %v86_v29 = vpop.permute.xlu1 %85  }
  0x8d   :  { %82 = vst.msk [vmem:[#allocation0] sm:$0x1] %vm81_vm13, %v80_v28  }
  0x8e   :  { %88 = vst.msk [vmem:[#allocation0] sm:$0x1] %vm87_vm14, %v86_v29  }
  0x90   :  { %v92_v30 = vpop.permute.xlu0 %91  }
  0x91   :  { %94 = vst.msk [vmem:[#allocation0] sm:$0x1] %vm93_vm15, %v92_v30  }
  0x98   :  { %v98_v31 = vld [vmem:[#allocation0] sm:$0x1] }
  0x99   :  { %100 = vst [vmem:[%s208_s1] sm:$0x1] %v98_v31 }

// kernel: fbprob_forward.1
= control target key start
LH: loop header
LB: loop body
LE: loop exit
PB: predicated region body
PF: predicated region fallthrough
CT: control target
= control target key end

     0   :  { %v354_v3 = vmov 0.0   ;;  %s589_s1 = inlined_call_operand.vmem [shape: f32[128,256], index: 1, kind: input, shape index: {}]   ;;  %s590_s3 = inlined_call_operand.vmem [shape: f32[256,128], index: 3, kind: input, shape index: {}]   ;;  %s591_s0 = inlined_call_operand.vmem [shape: f32[8,128], index: 0, kind: input, shape index: {}]   ;;  %s592_s2 = inlined_call_operand.vmem [shape: f32[1,256], index: 2, kind: input, shape index: {}]   ;;  %s593_s4 = inlined_call_operand.vmem [shape: f32[1,128], index: 4, kind: input, shape index: {}]   ;;  %s594_s5 = inlined_call_operand.vmem [shape: f32[8,128], index: 5, kind: output, shape index: {}]  }
   0x1   :  { %v22_v0 = vld [vmem:[%s589_s1 + $0x8] sm:$0xff]  ;;  %v24_v1 = vld [vmem:[%s589_s1 + $0x18] sm:$0xff]  ;;  %v21_v2 = vld [vmem:[%s589_s1] sm:$0xff]  ;;  %129 = vmatprep.mubr.f32.mxu0 %v354_v3 }
   0x2   :  { %v289_v4 = vpack.c.bf16 %v24_v1, %v22_v0  ;;  %v23_v5 = vld [vmem:[%s589_s1 + $0x10] sm:$0xff]  ;;  %v26_v6 = vld [vmem:[%s589_s1 + $0x28] sm:$0xff]  ;;  %v28_v7 = vld [vmem:[%s589_s1 + $0x38] sm:$0xff] }
   0x3   :  { %v291_v8 = vpack.c.bf16 %v23_v5, %v21_v2  ;;  %v293_v9 = vpack.c.bf16 %v28_v7, %v26_v6  ;;  %v25_v10 = vld [vmem:[%s589_s1 + $0x20] sm:$0xff]  ;;  %v27_v11 = vld [vmem:[%s589_s1 + $0x30] sm:$0xff]  ;;  %v30_v12 = vld [vmem:[%s589_s1 + $0x48] sm:$0xff] }
   0x4   :  { %290 = vmatprep.subr.bf16.mxu0 %v289_v4  ;;  %v32_v13 = vld [vmem:[%s589_s1 + $0x58] sm:$0xff]  ;;  %v295_v14 = vpack.c.bf16 %v27_v11, %v25_v10  ;;  %v29_v16 = vld [vmem:[%s589_s1 + $0x40] sm:$0xff]  ;;  %v31_v17 = vld [vmem:[%s589_s1 + $0x50] sm:$0xff] }
   0x5   :  { %292 = vmatpush1.bf16.msra.mxu0 %v291_v8  ;;  %v297_v15 = vpack.c.bf16 %v32_v13, %v30_v12  ;;  %v34_v18 = vld [vmem:[%s589_s1 + $0x68] sm:$0xff]  ;;  %v36_v19 = vld [vmem:[%s589_s1 + $0x78] sm:$0xff]  ;;  %v299_v20 = vpack.c.bf16 %v31_v17, %v29_v16  ;;  %v33_v22 = vld [vmem:[%s589_s1 + $0x60] sm:$0xff] }
   0x6   :  { %294 = vmatprep.subr.bf16.mxu0 %v293_v9  ;;  %v301_v21 = vpack.c.bf16 %v36_v19, %v34_v18  ;;  %v35_v23 = vld [vmem:[%s589_s1 + $0x70] sm:$0xff]  ;;  %v38_v24 = vld [vmem:[%s589_s1 + $0x88] sm:$0xff]  ;;  %v40_v25 = vld [vmem:[%s589_s1 + $0x98] sm:$0xff] }
   0x7   :  { %v37_v26 = vld [vmem:[%s589_s1 + $0x80] sm:$0xff]  ;;  %v39_v27 = vld [vmem:[%s589_s1 + $0x90] sm:$0xff]  ;;  %v155_v29 = vld [vmem:[%s590_s3 + $0x88] sm:$0xff]  ;;  %v303_v31 = vpack.c.bf16 %v35_v23, %v33_v22  ;;  %v305_v36 = vpack.c.bf16 %v40_v25, %v38_v24 }
   0x8   :  { %v154_v28 = vld [vmem:[%s590_s3 + $0x80] sm:$0xff]  ;;  %v139_v33 = vld [vmem:[%s590_s3 + $0x8] sm:$0xff]  ;;  %v156_v34 = vld [vmem:[%s590_s3 + $0x90] sm:$0xff]  ;;  %v307_v46 = vpack.c.bf16 %v39_v27, %v37_v26 }
   0x9   :  { %296 = vmatpush1.bf16.msra.mxu0 %v295_v14  ;;  %v138_v30 = vld [vmem:[%s590_s3] sm:$0xff]  ;;  %v321_v32 = vpack.c.bf16 %v155_v29, %v154_v28  ;;  %v157_v35 = vld [vmem:[%s590_s3 + $0x98] sm:$0xff]  ;;  %v140_v39 = vld [vmem:[%s590_s3 + $0x10] sm:$0xff] }
   0xa   :  { %298 = vmatprep.subr.bf16.mxu0 %v297_v15  ;;  %v323_v37 = vpack.c.bf16 %v139_v33, %v138_v30  ;;  %v325_v38 = vpack.c.bf16 %v157_v35, %v156_v34  ;;  %v141_v40 = vld [vmem:[%s590_s3 + $0x18] sm:$0xff]  ;;  %v158_v41 = vld [vmem:[%s590_s3 + $0xa0] sm:$0xff]  ;;  %v42_v42 = vld [vmem:[%s589_s1 + $0xa8] sm:$0xff]  ;;  %v55_v34 = vlaneseq }
   0xb   :  { %v44_v43 = vld [vmem:[%s589_s1 + $0xb8] sm:$0xff]  ;;  %322 = vmatprep.subr.bf16.mxu1 %v321_v32  ;;  %v159_v44 = vld [vmem:[%s590_s3 + $0xa8] sm:$0xff]  ;;  %v327_v45 = vpack.c.bf16 %v141_v40, %v140_v39  ;;  %v41_v47 = vld [vmem:[%s589_s1 + $0xa0] sm:$0xff] }
   0xc   :  { %324 = vmatpush3.bf16.msra.mxu1 %v323_v37  ;;  %v329_v48 = vpack.c.bf16 %v159_v44, %v158_v41  ;;  %v142_v49 = vld [vmem:[%s590_s3 + $0x20] sm:$0xff]  ;;  %v143_v50 = vld [vmem:[%s590_s3 + $0x28] sm:$0xff]  ;;  %v309_v51 = vpack.c.bf16 %v44_v43, %v42_v42  ;;  %v43_v52 = vld [vmem:[%s589_s1 + $0xb0] sm:$0xff]  ;;  %v56_v35 = vshrl.u32 %v55_v34, 7 }
   0xd   :  { %300 = vmatpush1.bf16.msra.mxu0 %v299_v20  ;;  %326 = vmatprep.subr.bf16.mxu1 %v325_v38  ;;  %v160_v53 = vld [vmem:[%s590_s3 + $0xb0] sm:$0xff]  ;;  %v161_v54 = vld [vmem:[%s590_s3 + $0xb8] sm:$0xff]  ;;  %v46_v55 = vld [vmem:[%s589_s1 + $0xc8] sm:$0xff]  ;;  %v331_v57 = vpack.c.bf16 %v143_v50, %v142_v49  ;;  %v311_v58 = vpack.c.bf16 %v43_v52, %v41_v47 }
   0xe   :  { %302 = vmatprep.subr.bf16.mxu0 %v301_v21  ;;  %v48_v56 = vld [vmem:[%s589_s1 + $0xd8] sm:$0xff]  ;;  %v45_v59 = vld [vmem:[%s589_s1 + $0xc0] sm:$0xff]  ;;  %v333_v60 = vpack.c.bf16 %v161_v54, %v160_v53  ;;  %v144_v61 = vld [vmem:[%s590_s3 + $0x30] sm:$0xff]  ;;  %v61_v38 = vsub.s32 1, %v56_v35 }
   0xf   :  { %v145_v62 = vld [vmem:[%s590_s3 + $0x38] sm:$0xff]  ;;  %v313_v63 = vpack.c.bf16 %v48_v56, %v46_v55  ;;  %v47_v0 = vld [vmem:[%s589_s1 + $0xd0] sm:$0xff]  ;;  %v162_v1 = vld [vmem:[%s590_s3 + $0xc0] sm:$0xff] }
  0x10   :  { %328 = vmatpush3.bf16.msra.mxu1 %v327_v45  ;;  %v163_v2 = vld [vmem:[%s590_s3 + $0xc8] sm:$0xff]  ;;  %v52_v4 = vld [vmem:[%s589_s1 + $0xf8] sm:$0xff]  ;;  %v335_v5 = vpack.c.bf16 %v145_v62, %v144_v61  ;;  %v315_v6 = vpack.c.bf16 %v47_v0, %v45_v59  ;;  %v49_v7 = vld [vmem:[%s589_s1 + $0xe0] sm:$0xff] }
  0x11   :  { %304 = vmatpush1.bf16.msra.mxu0 %v303_v31  ;;  %330 = vmatprep.subr.bf16.mxu1 %v329_v48  ;;  %v50_v3 = vld [vmem:[%s589_s1 + $0xe8] sm:$0xff]  ;;  %v337_v8 = vpack.c.bf16 %v163_v2, %v162_v1  ;;  %v146_v9 = vld [vmem:[%s590_s3 + $0x40] sm:$0xff]  ;;  %v51_v12 = vld [vmem:[%s589_s1 + $0xf0] sm:$0xff] }
  0x12   :  { %306 = vmatprep.subr.bf16.mxu0 %v305_v36  ;;  %v147_v10 = vld [vmem:[%s590_s3 + $0x48] sm:$0xff]  ;;  %v317_v11 = vpack.c.bf16 %v52_v4, %v50_v3  ;;  %v164_v13 = vld [vmem:[%s590_s3 + $0xd0] sm:$0xff]  ;;  %v165_v14 = vld [vmem:[%s590_s3 + $0xd8] sm:$0xff]  ;;  %v319_v16 = vpack.c.bf16 %v51_v12, %v49_v7  ;;  %v57_v36 = vsub.s32 0, %v56_v35 }
  0x13   :  { %v339_v15 = vpack.c.bf16 %v147_v10, %v146_v9  ;;  %v341_v17 = vpack.c.bf16 %v165_v14, %v164_v13  ;;  %v148_v18 = vld [vmem:[%s590_s3 + $0x50] sm:$0xff]  ;;  %v149_v19 = vld [vmem:[%s590_s3 + $0x58] sm:$0xff]  ;;  %v166_v20 = vld [vmem:[%s590_s3 + $0xe0] sm:$0xff] }
  0x14   :  { %332 = vmatpush3.bf16.msra.mxu1 %v331_v57  ;;  %v167_v21 = vld [vmem:[%s590_s3 + $0xe8] sm:$0xff]  ;;  %v343_v22 = vpack.c.bf16 %v149_v19, %v148_v18  ;;  %v20_v23 = vld [vmem:[%s591_s0] sm:$0xff]  ;;  %v168_v28 = vld [vmem:[%s590_s3 + $0xf0] sm:$0xff] }
  0x15   :  { %308 = vmatpush1.bf16.msra.mxu0 %v307_v46  ;;  %334 = vmatprep.subr.bf16.mxu1 %v333_v60  ;;  %v345_v24 = vpack.c.bf16 %v167_v21, %v166_v20  ;;  %v150_v25 = vld [vmem:[%s590_s3 + $0x60] sm:$0xff]  ;;  %v151_v26 = vld [vmem:[%s590_s3 + $0x68] sm:$0xff]  ;;  %v169_v29 = vld [vmem:[%s590_s3 + $0xf8] sm:$0xff] }
  0x16   :  { %310 = vmatprep.subr.bf16.mxu0 %v309_v51  ;;  %v347_v27 = vpack.c.bf16 %v151_v26, %v150_v25  ;;  %v349_v30 = vpack.c.bf16 %v169_v29, %v168_v28  ;;  %v152_v31 = vld [vmem:[%s590_s3 + $0x70] sm:$0xff]  ;;  %v153_v32 = vld [vmem:[%s590_s3 + $0x78] sm:$0xff]  ;;  %v53_v37 = vld [vmem:[%s592_s2] sm:$0x3] }
  0x17   :  { %v351_v33 = vpack.c.bf16 %v153_v32, %v152_v31  ;;  %v58_v39 = vrot.slane %v53_v37, %v57_v36  ;;  %v62_v40 = vrot.slane %v53_v37, %v61_v38  ;;  %v253_v48 = vld [vmem:[%s593_s4] ss:$0 sm:$0xff] }
  0x18   :  { %336 = vmatpush3.bf16.msra.mxu1 %v335_v5 }
  0x19   :  { %312 = vmatpush1.bf16.msra.mxu0 %v311_v58  ;;  %338 = vmatprep.subr.bf16.mxu1 %v337_v8 }
  0x1a   :  { %314 = vmatprep.subr.bf16.mxu0 %v313_v63 }
  0x1c   :  { %340 = vmatpush3.bf16.msra.mxu1 %v339_v15 }
  0x1d   :  { %316 = vmatpush1.bf16.msra.mxu0 %v315_v6  ;;  %342 = vmatprep.subr.bf16.mxu1 %v341_v17 }
  0x1e   :  { %318 = vmatprep.subr.bf16.mxu0 %v317_v11 }
  0x20   :  { %344 = vmatpush3.bf16.msra.mxu1 %v343_v22 }
  0x21   :  { %320 = vmatpush1.bf16.msra.mxu0 %v319_v16  ;;  %346 = vmatprep.subr.bf16.mxu1 %v345_v24 }
  0x24   :  { %130 = vmatmul.mubr.f32.vlgmr.msra.gmra.mrb[0].mxu0 %v20_v23  ;;  %348 = vmatpush3.bf16.msra.mxu1 %v347_v27 }
  0x25   :  { %350 = vmatprep.subr.bf16.mxu1 %v349_v30 }
  0x28   :  { %352 = vmatpush3.bf16.msra.mxu1 %v351_v33 }
  0xf7   :  { %v131_v41 = vpop.f32.mrb[0].mxu0 }
  0xf8   :  { %v132_v42 = vadd.f32 %v131_v41, %v58_v39  ;;  %v133_v43 = vpop.f32.mrb[1].mxu0 }
  0xf9   :  { %v134_v44 = vadd.f32 %v133_v43, %v62_v40 }
  0xfa   :  { %v136_v46 = vmax.f32 %v132_v42, 0.0 }
  0xfb   :  { %v137_v45 = vmax.f32 %v134_v44, 0.0 }
  0xfd   :  { %241 = vmatprep.mubr.f32.mxu1 %v137_v45 }
  0xfe   :  { %242 = vmatmul.mubr.f32.vlgmr.msra.gmra.mrb[0].mxu1 %v136_v46 }
 0x1d1   :  { %v286_v47 = vpop.f32.mrb[0].mxu1 }
 0x1d2   :  { %v287_v49 = vpop.f32.mrb[1].mxu1 }
 0x1d3   :  { %v288_v50 = vadd.f32 %v287_v49, %v286_v47 }
 0x1d5   :  { %v244_v51 = vadd.f32 %v288_v50, %v253_v48 }
 0x1d7   :  { %v247_v52 = vmax.f32 %v244_v51, 0.0 }
 0x1d9   :  { %248 = vst [vmem:[%s594_s5] sm:$0xff] %v247_v52 }

</bundles_post_ra>
